<compile_context>
chip_gen: v7x
topology: tpu7x:2x2x1
jax: 0.10.0
libtpu: 0.0.40
codegen_flags: <defaults>
</compile_context>

<pallas_src>
import functools

import jax
import jax.numpy as jnp
from jax.experimental import pallas as pl
from jax.experimental.pallas import tpu as pltpu

EPS = 1e-5


def _compiler_params():
    # Tiny per-step blocks; 32 MiB leaves ample headroom on v5e/v6e/v7x.
    return pltpu.CompilerParams(
        dimension_semantics=("parallel",),
        vmem_limit_bytes=32 * 1024 * 1024,
    )


# --------------------------------------------------------------------------
# Kernel 1: conv1 as a single im2col matmul + per-sample BN1 partial stats.
#   p_ref : (1, 9*Cin, H*W)  bf16   im2col patches for this sample
#   w_ref : (Cmid, 9*Cin)    bf16   flattened conv1 weight
#   y_ref : (1, Cmid, H*W)   f32    conv1 output (lane-dense store)
#   sum/sq: (1, Cmid, 1)     f32    per-sample sum / sum-of-squares
# --------------------------------------------------------------------------
def _conv1_kernel(p_ref, w_ref, y_ref, sum_ref, sq_ref):
    y = jnp.dot(w_ref[...], p_ref[0], preferred_element_type=jnp.float32)
    y_ref[0] = y
    sum_ref[0] = jnp.sum(y, axis=1, keepdims=True)
    sq_ref[0] = jnp.sum(y * y, axis=1, keepdims=True)


# --------------------------------------------------------------------------
# Kernel 2: fused BN1(scale/shift) + ReLU + conv2 (in-kernel im2col via
# pltpu.roll lane shifts + iota masks) + per-sample BN2 partial stats.
# --------------------------------------------------------------------------
def _bn_relu_conv2_kernel(y1_ref, sc_ref, sh_ref, w_ref,
                          y2_ref, sum_ref, sq_ref, *, H, W):
    HW = H * W
    # One-pass fused BN + ReLU (scale/shift precomputed in the wrapper).
    h = jnp.maximum(y1_ref[0] * sc_ref[...] + sh_ref[...], 0.0)   # (Cmid, HW) f32

    lane = jax.lax.broadcasted_iota(jnp.int32, h.shape, 1)
    row = lane // W
    col = lane % W

    taps = []
    for dy in (-1, 0, 1):
        for dx in (-1, 0, 1):
            s = dy * W + dx                      # tap reads h[l + s]
            shifted = pltpu.roll(h, (-s) % HW, axis=1) if s else h
            valid = ((row + dy >= 0) & (row + dy < H) &
                     (col + dx >= 0) & (col + dx < W))
            taps.append(jnp.where(valid, shifted, 0.0))
    # (9*Cmid, HW) bf16 patches -> one MXU matmul (f32 accumulation).
    patches = jnp.concatenate(taps, axis=0).astype(jnp.bfloat16)
    y2 = jnp.dot(w_ref[...], patches, preferred_element_type=jnp.float32)

    y2_ref[0] = y2
    sum_ref[0] = jnp.sum(y2, axis=1, keepdims=True)
    sq_ref[0] = jnp.sum(y2 * y2, axis=1, keepdims=True)


# --------------------------------------------------------------------------
# Kernel 3: fused BN2(scale/shift) + ReLU, lane-dense elementwise.
# --------------------------------------------------------------------------
def _bn_relu_kernel(y_ref, sc_ref, sh_ref, o_ref):
    o_ref[0] = jnp.maximum(y_ref[0] * sc_ref[...] + sh_ref[...], 0.0)


def _bn_scale_shift(sum_part, sq_part, gamma, beta, count):
    """Fold train-mode BN into (scale, shift) from global sum / sum-of-squares."""
    s = jnp.sum(sum_part, axis=0)[:, 0]           # (C,)
    sq = jnp.sum(sq_part, axis=0)[:, 0]
    mean = s / count
    var = sq / count - mean * mean                # biased variance (train-mode BN)
    scale = gamma * jax.lax.rsqrt(var + EPS)
    shift = beta - mean * scale
    return (scale[:, None].astype(jnp.float32),
            shift[:, None].astype(jnp.float32))


def conv_block_forward(x_nchw, params):
    """x_nchw: (N, Cin, H, W) f32  ->  (N, Cout, H, W) f32 (ConvBlock forward)."""
    w1, b1, g1, be1, w2, b2, g2, be2 = params
    del b1, b2  # bias before train-mode BN is exactly cancelled by mean subtraction
    N, Cin, H, W = x_nchw.shape
    Cmid = w1.shape[-1]
    Cout = w2.shape[-1]
    HW = H * W
    K1, K2 = 9 * Cin, 9 * Cmid

    # ---- wrapper-side im2col for conv1 (tap-major rows, lane dim = H*W) ----
    xp = jnp.pad(x_nchw, ((0, 0), (0, 0), (1, 1), (1, 1)))
    taps = [xp[:, :, dy:dy + H, dx:dx + W] for dy in range(3) for dx in range(3)]
    p1 = jnp.stack(taps, axis=1).reshape(N, K1, HW).astype(jnp.bfloat16)
    # Weights are HWIO (kh, kw, Cin, Cout) == PyTorch weight.permute(2, 3, 1, 0).
    w1f = w1.reshape(K1, Cmid).T.astype(jnp.bfloat16)          # (Cmid, 9*Cin)
    w2f = w2.reshape(K2, Cout).T.astype(jnp.bfloat16)          # (Cout, 9*Cmid)

    cparams = _compiler_params()

    # ---- conv1 + per-sample BN1 partial stats --------------------------------
    y1, s1, q1 = pl.pallas_call(
        _conv1_kernel,
        grid=(N,),
        in_specs=[
            pl.BlockSpec((1, K1, HW), lambda n: (n, 0, 0)),
            pl.BlockSpec((Cmid, K1), lambda n: (0, 0)),
        ],
        out_specs=[
            pl.BlockSpec((1, Cmid, HW), lambda n: (n, 0, 0)),
            pl.BlockSpec((1, Cmid, 1), lambda n: (n, 0, 0)),
            pl.BlockSpec((1, Cmid, 1), lambda n: (n, 0, 0)),
        ],
        out_shape=[
            jax.ShapeDtypeStruct((N, Cmid, HW), jnp.float32),
            jax.ShapeDtypeStruct((N, Cmid, 1), jnp.float32),
            jax.ShapeDtypeStruct((N, Cmid, 1), jnp.float32),
        ],
        compiler_params=cparams,
    )(p1, w1f)

    scale1, shift1 = _bn_scale_shift(s1, q1, g1, be1, N * HW)

    # ---- BN1 + ReLU + conv2 + per-sample BN2 partial stats -------------------
    y2, s2, q2 = pl.pallas_call(
        functools.partial(_bn_relu_conv2_kernel, H=H, W=W),
        grid=(N,),
        in_specs=[
            pl.BlockSpec((1, Cmid, HW), lambda n: (n, 0, 0)),
            pl.BlockSpec((Cmid, 1), lambda n: (0, 0)),
            pl.BlockSpec((Cmid, 1), lambda n: (0, 0)),
            pl.BlockSpec((Cout, K2), lambda n: (0, 0)),
        ],
        out_specs=[
            pl.BlockSpec((1, Cout, HW), lambda n: (n, 0, 0)),
            pl.BlockSpec((1, Cout, 1), lambda n: (n, 0, 0)),
            pl.BlockSpec((1, Cout, 1), lambda n: (n, 0, 0)),
        ],
        out_shape=[
            jax.ShapeDtypeStruct((N, Cout, HW), jnp.float32),
            jax.ShapeDtypeStruct((N, Cout, 1), jnp.float32),
            jax.ShapeDtypeStruct((N, Cout, 1), jnp.float32),
        ],
        compiler_params=cparams,
    )(y1, scale1, shift1, w2f)

    scale2, shift2 = _bn_scale_shift(s2, q2, g2, be2, N * HW)

    # ---- BN2 + ReLU (lane-dense output store) --------------------------------
    out = pl.pallas_call(
        _bn_relu_kernel,
        grid=(N,),
        in_specs=[
            pl.BlockSpec((1, Cout, HW), lambda n: (n, 0, 0)),
            pl.BlockSpec((Cout, 1), lambda n: (0, 0)),
            pl.BlockSpec((Cout, 1), lambda n: (0, 0)),
        ],
        out_specs=pl.BlockSpec((1, Cout, HW), lambda n: (n, 0, 0)),
        out_shape=jax.ShapeDtypeStruct((N, Cout, HW), jnp.float32),
        compiler_params=cparams,
    )(y2, scale2, shift2)

    # Free view back to NCHW (contiguous, no transpose).
    return out.reshape(N, Cout, H, W)


def reference_forward(x_nchw, params, matmul_dtype=jnp.float32):
    """Pure-JAX reference (conv + train-mode BN + ReLU), NCHW.

    matmul_dtype=bfloat16 mirrors the kernel's bf16 MXU operands (f32 accum).
    """
    w1, b1, g1, be1, w2, b2, g2, be2 = params

    def conv(x, w, b):
        y = jax.lax.conv_general_dilated(
            x.astype(matmul_dtype), w.astype(matmul_dtype),
            window_strides=(1, 1), padding=((1, 1), (1, 1)),
            dimension_numbers=("NCHW", "HWIO", "NCHW"),
            preferred_element_type=jnp.float32)
        return y + b[None, :, None, None]

    def bn_relu(y, g, be):
        mean = jnp.mean(y, axis=(0, 2, 3), keepdims=True)
        var = jnp.mean((y - mean) ** 2, axis=(0, 2, 3), keepdims=True)
        h = (y - mean) * jax.lax.rsqrt(var + EPS)
        h = h * g[None, :, None, None] + be[None, :, None, None]
        return jnp.maximum(h, 0.0)

    h = bn_relu(conv(x_nchw, w1, b1), g1, be1)
    return bn_relu(conv(h, w2, b2), g2, be2)


def init_params(key, in_channel, mid_channel, out_channel):
    k1, k2, k3, k4 = jax.random.split(key, 4)
    w1 = 0.1 * jax.random.normal(k1, (3, 3, in_channel, mid_channel), jnp.float32)
    b1 = 0.1 * jax.random.normal(k2, (mid_channel,), jnp.float32)
    g1 = jnp.ones((mid_channel,), jnp.float32)      # BN default init
    be1 = jnp.zeros((mid_channel,), jnp.float32)
    w2 = 0.1 * jax.random.normal(k3, (3, 3, mid_channel, out_channel), jnp.float32)
    b2 = 0.1 * jax.random.normal(k4, (out_channel,), jnp.float32)
    g2 = jnp.ones((out_channel,), jnp.float32)
    be2 = jnp.zeros((out_channel,), jnp.float32)
    return (w1, b1, g1, be1, w2, b2, g2, be2)


if __name__ == "__main__":
    key = jax.random.PRNGKey(0)
    kx, kp = jax.random.split(key)

    # ConvBlock(in_channel=4, out_channel=8) -> mid_channel = 8
    N, Cin, H, W = 2, 4, 16, 16
    Cmid, Cout = 8, 8

    x = jax.random.normal(kx, (N, Cin, H, W), jnp.float32)
    params = init_params(kp, Cin, Cmid, Cout)

    out = jax.block_until_ready(conv_block_forward(x, params))
    assert out.shape == (N, Cout, H, W)

    # Tight check against a reference that mirrors the kernel's bf16 MXU
    # operands (f32 accumulation); structure / layout / BN-fusion correctness.
    ref_bf16 = jax.block_until_ready(reference_forward(x, params, jnp.bfloat16))
    assert jnp.max(jnp.abs(out - ref_bf16)) < 2e-3, "mismatch vs bf16-matmul reference"

    # Loose sanity check against the full-f32 reference (bf16 rounding headroom).
    ref_f32 = jax.block_until_ready(reference_forward(x, params, jnp.float32))
    assert jnp.max(jnp.abs(out - ref_f32)) < 3e-2, "mismatch vs f32 reference"

    print("KERNEL_OK")
</pallas_src>

<mosaic_0001>
module attributes {stable_mosaic.version = 11 : i64} {
  func.func @_conv1_kernel(%arg0: i32, %arg1: memref<1x36x256xbf16, #tpu.memory_space<vmem>>, %arg2: memref<8x36xbf16, #tpu.memory_space<vmem>>, %arg3: memref<1x8x256xf32, #tpu.memory_space<vmem>>, %arg4: memref<1x8x1xf32, #tpu.memory_space<vmem>>, %arg5: memref<1x8x1xf32, #tpu.memory_space<vmem>>) attributes {dimension_semantics = [#tpu.dimension_semantics<parallel>], iteration_bounds = array<i64: 2>, scalar_prefetch = 0 : i64, scratch_operands = 0 : i64, tpu.core_type = #tpu.core_type<tc>, window_params = [{transform_indices = @transform_0, window_bounds = array<i64: 1, 36, 256>}, {pipeline_mode = #tpu.pipeline_mode<synchronous>, transform_indices = @transform_1, window_bounds = array<i64: 8, 36>}, {transform_indices = @transform_2, window_bounds = array<i64: 1, 8, 256>}, {transform_indices = @transform_3, window_bounds = array<i64: 1, 8, 1>}, {transform_indices = @transform_4, window_bounds = array<i64: 1, 8, 1>}]} {
    %c0 = arith.constant 0 : index
    %c0_0 = arith.constant 0 : index
    %0 = vector.load %arg2[%c0, %c0_0] : memref<8x36xbf16, #tpu.memory_space<vmem>>, vector<8x36xbf16>
    %c0_1 = arith.constant 0 : index
    %c0_2 = arith.constant 0 : index
    %c0_3 = arith.constant 0 : index
    %1 = vector.load %arg1[%c0_1, %c0_2, %c0_3] : memref<1x36x256xbf16, #tpu.memory_space<vmem>>, vector<1x36x256xbf16>
    %2 = vector.shape_cast %1 : vector<1x36x256xbf16> to vector<36x256xbf16>
    %cst = arith.constant dense<0.000000e+00> : vector<8x256xf32>
    %3 = tpu.matmul %0, %2, %cst {dimension_numbers = #tpu.dot_dimension_numbers<[1], [0], [0], [1], [0, 0, 1, 1], [], []>} : vector<8x36xbf16>, vector<36x256xbf16>, vector<8x256xf32> -> vector<8x256xf32>
    %c0_4 = arith.constant 0 : index
    %c0_5 = arith.constant 0 : index
    %c0_6 = arith.constant 0 : index
    %4 = vector.load %arg3[%c0_4, %c0_5, %c0_6] : memref<1x8x256xf32, #tpu.memory_space<vmem>>, vector<1x8x256xf32>
    %5 = vector.shape_cast %4 : vector<1x8x256xf32> to vector<8x256xf32>
    %6 = vector.shape_cast %3 : vector<8x256xf32> to vector<1x8x256xf32>
    tpu.vector_store %arg3[%c0_4, %c0_5, %c0_6], %6 {strides = array<i32>} : memref<1x8x256xf32, #tpu.memory_space<vmem>>, vector<1x8x256xf32>,
    %cst_7 = arith.constant dense<0.000000e+00> : vector<8xf32>
    %7 = vector.multi_reduction <add>, %3, %cst_7 [1] : vector<8x256xf32> to vector<8xf32>
    %8 = vector.shape_cast %7 : vector<8xf32> to vector<8x1xf32>
    %c0_8 = arith.constant 0 : index
    %c0_9 = arith.constant 0 : index
    %c0_10 = arith.constant 0 : index
    %9 = vector.load %arg4[%c0_8, %c0_9, %c0_10] : memref<1x8x1xf32, #tpu.memory_space<vmem>>, vector<1x8x1xf32>
    %10 = vector.shape_cast %9 : vector<1x8x1xf32> to vector<8x1xf32>
    %11 = vector.shape_cast %8 : vector<8x1xf32> to vector<1x8x1xf32>
    tpu.vector_store %arg4[%c0_8, %c0_9, %c0_10], %11 {strides = array<i32>} : memref<1x8x1xf32, #tpu.memory_space<vmem>>, vector<1x8x1xf32>,
    %12 = arith.mulf %3, %3 : vector<8x256xf32>
    %cst_11 = arith.constant dense<0.000000e+00> : vector<8xf32>
    %13 = vector.multi_reduction <add>, %12, %cst_11 [1] : vector<8x256xf32> to vector<8xf32>
    %14 = vector.shape_cast %13 : vector<8xf32> to vector<8x1xf32>
    %c0_12 = arith.constant 0 : index
    %c0_13 = arith.constant 0 : index
    %c0_14 = arith.constant 0 : index
    %15 = vector.load %arg5[%c0_12, %c0_13, %c0_14] : memref<1x8x1xf32, #tpu.memory_space<vmem>>, vector<1x8x1xf32>
    %16 = vector.shape_cast %15 : vector<1x8x1xf32> to vector<8x1xf32>
    %17 = vector.shape_cast %14 : vector<8x1xf32> to vector<1x8x1xf32>
    tpu.vector_store %arg5[%c0_12, %c0_13, %c0_14], %17 {strides = array<i32>} : memref<1x8x1xf32, #tpu.memory_space<vmem>>, vector<1x8x1xf32>,
    return
  }
  func.func @transform_0(%arg0: i32) -> (i32, i32, i32) {
    %c0_i32 = arith.constant 0 : i32
    %c0_i32_0 = arith.constant 0 : i32
    %c0_i32_1 = arith.constant 0 : i32
    return %arg0, %c0_i32, %c0_i32_0 : i32, i32, i32
  }
  func.func @transform_1(%arg0: i32) -> (i32, i32) {
    %c0_i32 = arith.constant 0 : i32
    %c0_i32_0 = arith.constant 0 : i32
    %c0_i32_1 = arith.constant 0 : i32
    return %c0_i32, %c0_i32_0 : i32, i32
  }
  func.func @transform_2(%arg0: i32) -> (i32, i32, i32) {
    %c0_i32 = arith.constant 0 : i32
    %c0_i32_0 = arith.constant 0 : i32
    %c0_i32_1 = arith.constant 0 : i32
    return %arg0, %c0_i32, %c0_i32_0 : i32, i32, i32
  }
  func.func @transform_3(%arg0: i32) -> (i32, i32, i32) {
    %c0_i32 = arith.constant 0 : i32
    %c0_i32_0 = arith.constant 0 : i32
    %c0_i32_1 = arith.constant 0 : i32
    return %arg0, %c0_i32, %c0_i32_0 : i32, i32, i32
  }
  func.func @transform_4(%arg0: i32) -> (i32, i32, i32) {
    %c0_i32 = arith.constant 0 : i32
    %c0_i32_0 = arith.constant 0 : i32
    %c0_i32_1 = arith.constant 0 : i32
    return %arg0, %c0_i32, %c0_i32_0 : i32, i32, i32
  }
}

</mosaic_0001>

<bundles_post_ra>
// kernel: tpu_custom_call.1
= control target key start
LH: loop header
LB: loop body
LE: loop exit
PB: predicated region body
PF: predicated region fallthrough
CT: control target
= control target key end

     0   :  { %10 = vsyncpa [#allocation3], 0  ;;  %s719_s0 = inlined_call_operand.vmem [shape: bf16[2,36,256], index: 0, kind: input, shape index: {}]   ;;  %s720_s1 = inlined_call_operand.vmem [shape: bf16[8,36], index: 1, kind: input, shape index: {}]   ;;  %s721_s2 = inlined_call_operand.hbm [shape: f32[2,8,256], index: 2, kind: output, shape index: {0}]   ;;  %s722_s3 = inlined_call_operand.vmem [shape: f32[2,8,1], index: 3, kind: output, shape index: {1}]   ;;  %s723_s4 = inlined_call_operand.vmem [shape: f32[2,8,1], index: 4, kind: output, shape index: {2}]  }
   0x1   :  { %12 = vsyncpa [#allocation3 + $0x1], 0  ;;  %s612_s15 = smov 0   ;;  %s614_s16 = smov 0  }
   0x2   :  { %s616_s17 = smov 0   ;;  %s618_s18 = smov 0  }
   0x3 LB: > { %s633_s19 = sadd.s32 4294967295, %s583_s18   ;;  %s450_s20 = sadd.s32 4294967294, %s583_s18   ;;  %s583_s18 = sphi %s618_s18, %s729_s18   ;;  %s579_s17 = sphi %s616_s17, %s728_s17   ;;  %s575_s16 = sphi %s614_s16, %s727_s16   ;;  %s571_s15 = sphi %s612_s15, %s726_s15  }
   0x4   : > { %s637_s21 = sadd.s32 1, %s583_s18   ;;  %s72_s22 = sadd.s32 1, %s579_s17 }
   0x5   : > { %s69_s23 = ssub.s32 %s583_s18, %s637_s21  ;;  %p82_p0 = scmp.ne.s32.totalorder %s579_s17, %s575_s16 }
   0x6   : > { %p70_p1 = scmp.eq.s32.totalorder %s69_s23, 0  ;;  %p83_p2 = scmp.eq.s32.totalorder %s633_s19, 1 }
   0x7   : > { %p88_p3 = scmp.ne.s32.totalorder %s575_s16, %s571_s15  ;;  %p89_p4 = scmp.eq.s32.totalorder %s450_s20, 1 }
   0x8   : > { %s648_s24 = scalar_select %p70_p1, %s579_s17, %s72_s22  }
   0x9   : > { %p650_p5 = por %p83_p2, %p82_p0  ;;  %p654_p6 = por %p89_p4, %p88_p3 }
   0xa   : > { %p453_p7 = scmp.ge.s32.totalorder %s583_s18, 1  ;;  %p170_p8 = scmp.lt.s32.totalorder %s583_s18, 3 }
   0xc   : > { %p171_p9 = pnand %p453_p7, %p170_p8 }
   0xd   : > { %p204_p10 = scmp.lt.s32.totalorder (!%p171_p9), %s633_s19, 1  ;;  %v585_v0 = vmov (!%p171_p9), 0   ;;  %vm253_vm0 = vcmask (!%p171_p9), 1041408   ;;  %v218_v9 = vld [vmem:[%s720_s1] sm:$0xf] (!%p171_p9)  ;;  %vm249_vm1 = vcmask (!%p171_p9), 293888  }
   0xe   : > { %174 = sbr.rel (%p171_p9) target bundleno = 401 (0x191), region = 28  ;;  %292 = vmatprep.mubr.bf16.mxu0 (!%p171_p9), %v585_v0  ;;  %s189_s8 = sand.u32 (!%p171_p9), 1, %s575_s16  }
   0xf   : > { %s454_s9 = sshll.u32 (!%p171_p9), %s189_s8, 4  ;;  %s471_s11 = sshll.u32 (!%p171_p9), %s633_s19, 8 }
  0x10   : > { %s191_s10 = scalar_lea.vmem (!%p171_p9), [#allocation2], %s454_s9  ;;  %s676_s20 = scalar_lea.hbm (!%p171_p9), %s721_s2, %s471_s11 }
  0x11   : > { %s337_s12 = sshll.u32 (!%p171_p9), %s191_s10, 4  ;;  %s315_s22 = scalar_lea.sflag (!%p171_p9), [#allocation3], %s189_s8  ;;  %s338_s12 = int_to_ptr.vmem [resolvable:$true] %s337_s12 }
  0x12   : > { %s521_s23 = scalar_lea.vmem (!%p171_p9), %s338_s12, 256 }
  0x13   : > { %p522_p11 = scmp.ne.s32.totalorder (!%p171_p9), %s338_s12, %s521_s23 }
  0x15   : > { %s662_s27 = scalar_select %p204_p10, %s633_s19, 1 }
  0x16   : > { %p523_p12 = pnand %p522_p11, %p650_p5 }
  0x17   : > { %s472_s28 = smul.u32 40, %s662_s27 }
  0x18   : > { %p524_p13 = pneg %p523_p12 }
  0x19   : > { %s208_s5 = scalar_lea.vmem %s719_s0, %s472_s28  ;;  %s586_s28 = smov [#allocation2]  }
  0x1a   : > { %v513_v1 = vld [vmem:[%s208_s5 + $0x4] ss:$8 sps:$4 sm:$0xff]   ;;  %v515_v2 = vld [vmem:[%s208_s5] ss:$8 sps:$4 sm:$0xff]   ;;  %v516_v3 = vld [vmem:[%s208_s5 + $0x14] ss:$8 sps:$4 sm:$0xff]  }
  0x1b   : > { %260 = vmatprep.subr.bf16.mxu0 %v513_v1  ;;  %v223_v4 = vld [vmem:[%s208_s5 + $0x20] sm:$0x33]  ;;  %v518_v5 = vld [vmem:[%s208_s5 + $0x10] ss:$8 sps:$4 sm:$0xff]   ;;  %s525_s29 = sshll.u32 %s586_s28, 4  ;;  %s526_s29 = int_to_ptr.vmem [resolvable:$false] %s525_s29 }
  0x1c   : > { %261 = vmatpush1.bf16.msra.mxu0 %v515_v2  ;;  %v463_v6 = vcombine.high %v223_v4, %v223_v4  ;;  %v462_v7 = vcombine.low %v223_v4, %v223_v4  ;;  %s527_s30 = scalar_lea.vmem %s526_s29, 512  ;;  %p528_p0 = scmp.lt.s32.totalorder %s338_s12, %s526_s29 }
  0x1d   : > { %262 = vmatprep.subr.bf16.mxu0 %v516_v3  ;;  %p529_p1 = scmp.lt.s32.totalorder %s527_s30, %s521_s23 }
  0x1e   : > { %v255_v8 = vsel %vm253_vm0, %v462_v7, 0 }
  0x1f   : > { %p530_p2 = por %p529_p1, %p528_p0 }
  0x20   : > { %263 = vmatpush1.bf16.msra.mxu0 %v518_v5 }
  0x21   : > { %464 = vmatprep.subr.msk.bf16.mxu0 %vm253_vm0, %v463_v6  ;;  %p531_p3 = pnand %p530_p2, %p524_p13 }
  0x24   : > { %265 = vmatpush1.bf16.msra.mxu0 %v255_v8 }
  0x27   : > { %465 = vmatmul.mubr.msk.bf16.vlgmr.msra.gmra.mrb[0].mxu0 %vm249_vm1, %v218_v9 }
  0xfa   : > { %v294_v10 = vpop.f32.mrb[0].mxu0 }
  0xfb   : > { %301 = vst [vmem:[%s191_s10] sm:$0xff] %v294_v10  ;;  %v296_v11 = vpop.f32.mrb[1].mxu0  ;;  %v308_v12 = vmul.f32 %v294_v10, %v294_v10 }
  0xfc   : > { %302 = vst [vmem:[%s191_s10 + $0x8] sm:$0xff] %v296_v11  ;;  %v298_v13 = vpop.f32.mrb[2].mxu0  ;;  %v303_v14 = vadd.f32 %v296_v11, %v294_v10  ;;  %v309_v15 = vmul.f32 %v296_v11, %v296_v11 }
  0xfd   : > { %v299_v16 = vpop.f32.mrb[3].mxu0 }
  0xfe   : > { %304 = vadd.xlane.f32.xlu0 %v303_v14  ;;  %v310_v17 = vadd.f32 %v309_v15, %v308_v12 }
 0x102   : > { %311 = vadd.xlane.f32.xlu0 %v310_v17 }
 0x103   : > { %534 = shalt.err (!%p531_p3)
}
 0x104   : > { %s535_s19 = scalar_lea.hbm %s676_s20, 256  ;;  %s539_s7 = scalar_lea.hbm %s721_s2, 512 }
 0x105   : > { %p536_p4 = scmp.ne.s32.totalorder %s676_s20, %s535_s19  ;;  %p540_p9 = scmp.lt.u32.totalorder %s676_s20, %s721_s2 }
 0x106   : > { %p541_p10 = scmp.lt.u32.totalorder %s539_s7, %s535_s19  ;;  %p543_p12 = scmp.lt.u32.totalorder %s535_s19, %s676_s20 }
 0x107   : > { %p537_p7 = pnand %p536_p4, %p650_p5 }
 0x108   : > { %p542_p11 = por %p541_p10, %p540_p9 }
 0x109   : > { %p538_p8 = pneg %p537_p7 }
 0x10a   : > { %p544_p13 = por %p543_p12, %p542_p11 }
 0x10c   : > { %p545_p0 = pnand %p544_p13, %p538_p8 }
 0x10e   : > { %548 = shalt.err (!%p545_p0)
}
 0x10f   : > { %473 = dma.vmem_to_hbm [thread:$0]  (%p650_p5), %s338_s12, 256, %s676_s20, %s315_s22   ;;  %vm306_vm2 = vcmask 7168  }
 0x110   : > { %s456_s10 = sshll.u32 %s662_s27, 3 }
 0x111   : > { %s212_s14 = scalar_lea.vmem %s722_s3, %s456_s10  ;;  %s216_s29 = scalar_lea.vmem %s723_s4, %s456_s10 }
 0x18b   : > { %v305_v18 = vpop.xlane.xlu0 %304 }
 0x18c   : > { %307 = vst.msk [vmem:[%s212_s14] sm:$0xff] %vm306_vm2, %v305_v18 }
 0x18f   : > { %v312_v19 = vpop.xlane.xlu0 %311 }
 0x190   : > { %313 = vst.msk [vmem:[%s216_s29] sm:$0xff] %vm306_vm2, %v312_v19 }
 0x191 PF: > { %p479_p1 = scmp.ge.s32.totalorder %s583_s18, 2  ;;  %s355_s25 = sand.u32 1, %s571_s15  }
 0x192   : > { %s356_s27 = scalar_lea.sflag [#allocation3], %s355_s25 }
 0x193   : > { %p476_p5 = pnand %p479_p1, %p654_p6 }
 0x195   : > { %566 = dma.done.wait (!%p476_p5), %s356_s27, 256  }
 0x196   : > { %568 = vsyncadd (!%p476_p5), %s356_s27, 4294967040  ;;  %p15_p2 = scmp.ge.s32.totalorder %s637_s21, 4   ;;  %s726_s15 = smov %s575_s16 }
 0x197   : > { %s727_s16 = smov %s579_s17  ;;  %s728_s17 = smov %s648_s24 }
 0x198   : > { %s729_s18 = smov %s637_s21  ;;  %17 = sbr.rel (!%p15_p2) target bundleno = 3 (0x3), region = 87 }
 0x19f   :  { %375 = vsyncpa [#allocation3], 1 }
 0x1a0   :  { %377 = vsyncpa [#allocation3 + $0x1], 1 }

</bundles_post_ra>
